<compile_context>
chip_gen: v6e
topology: v6e:2x2x1
jax: 0.10.0
libtpu: 0.0.40
codegen_flags: <defaults>
</compile_context>

<pallas_src>
import math

import jax
import jax.numpy as jnp
from jax.experimental import pallas as pl
from jax.experimental.pallas import tpu as pltpu


def _scale_kernel(x_ref, s_ref, o_ref):
    # x_ref: (tile_rows, tile_d) VMEM tile, s_ref: (1, tile_d) resident block
    o_ref[...] = x_ref[...] * s_ref[...]


_SUBLANE = {4: 8, 2: 16, 1: 32}        # dtype bytes -> minimum sublane multiple
_TARGET_TILE_BYTES = 4 * 1024 * 1024   # per-tile footprint target (x and out each)
_MAX_TILE_D = 2048                     # lane-axis block cap (multiple of 128)


def scale_forward(x, scale, *, force_pallas=False, min_pallas_elements=1 << 14):
    """Elementwise x * scale with scale broadcast over the last dimension.

    x:     (..., D) array
    scale: (D,)     array
    """
    orig_shape = x.shape
    D = orig_shape[-1]
    assert scale.shape == (D,), f"scale must have shape ({D},), got {scale.shape}"
    scale = scale.astype(x.dtype)

    # Genuinely tiny problems: a standalone pallas_call is launch-dominated,
    # let XLA fuse the multiply into the surrounding graph instead.
    if not force_pallas and x.size < min_pallas_elements:
        return x * scale

    rows = 1
    for d in orig_shape[:-1]:
        rows *= d
    rows = max(rows, 1)

    x2 = x.reshape(rows, D)
    s_vec = scale

    # ---- lane-dense folding: if D < 128, fold k rows into the lane axis so
    # the block last dim becomes a multiple of 128. The multiply stays correct
    # because scale simply tiles along the folded rows.
    rows_eff, D_eff = rows, D
    if D < 128:
        k = 128 // math.gcd(D, 128)
        if k > 1 and rows % k == 0:
            rows_eff = rows // k
            D_eff = k * D
            x2 = x2.reshape(rows_eff, D_eff)
            s_vec = jnp.tile(scale, k)
    s2 = s_vec.reshape(1, D_eff)

    itemsize = jnp.dtype(x.dtype).itemsize
    sublane = _SUBLANE.get(itemsize, 8)

    # ---- D tiling: whole D if it fits, otherwise 2048-lane blocks
    # (multiple of 128, ragged last block handled by Pallas masking).
    tile_d = D_eff if D_eff <= _MAX_TILE_D else _MAX_TILE_D

    # ---- row tiling: largest multiple of `sublane` that keeps one tile under
    # the VMEM budget; full-extent block if the whole array is smaller.
    tile_rows = _TARGET_TILE_BYTES // max(tile_d * itemsize, 1)
    tile_rows = max((tile_rows // sublane) * sublane, sublane)
    if tile_rows >= rows_eff:
        tile_rows = rows_eff  # full-extent block is always layout-legal

    grid = (pl.cdiv(rows_eff, tile_rows), pl.cdiv(D_eff, tile_d))

    out = pl.pallas_call(
        _scale_kernel,
        out_shape=jax.ShapeDtypeStruct((rows_eff, D_eff), x.dtype),
        grid_spec=pltpu.PrefetchScalarGridSpec(
            num_scalar_prefetch=0,
            grid=grid,
            in_specs=[
                pl.BlockSpec((tile_rows, tile_d), lambda i, j: (i, j)),
                pl.BlockSpec((1, tile_d), lambda i, j: (0, j)),
            ],
            out_specs=pl.BlockSpec((tile_rows, tile_d), lambda i, j: (i, j)),
        ),
        compiler_params=pltpu.CompilerParams(
            dimension_semantics=("parallel", "parallel"),
            vmem_limit_bytes=32 * 1024 * 1024,
        ),
    )(x2, s2)

    return out.reshape(orig_shape)


if __name__ == "__main__":
    key = jax.random.PRNGKey(0)
    kx, ks = jax.random.split(key)

    # Module: Scale(dim=32, init_value=1.0). Deterministic init:
    # init_value * ones(dim), perturbed so the multiply is non-trivial.
    B, S, D = 2, 8, 32
    init_value = 1.0
    scale_param = init_value * jnp.ones((D,), dtype=jnp.float32)
    scale_param = scale_param + 0.1 * jax.random.normal(ks, (D,), dtype=jnp.float32)

    x = jax.random.normal(kx, (B, S, D), dtype=jnp.float32)

    # force_pallas=True so the demo exercises the kernel despite the tiny size.
    y = scale_forward(x, scale_param, force_pallas=True)
    y = jax.block_until_ready(y)

    # Correctness check against plain-JAX reference (same broadcasting as PyTorch).
    y_ref = x * scale_param
    assert jnp.allclose(y, y_ref, atol=1e-6, rtol=1e-6)

    print("KERNEL_OK")
</pallas_src>

<mosaic_0001>
module attributes {stable_mosaic.version = 11 : i64} {
  func.func @_scale_kernel(%arg0: i32, %arg1: i32, %arg2: memref<4x128xf32, #tpu.memory_space<vmem>>, %arg3: memref<1x128xf32, #tpu.memory_space<vmem>>, %arg4: memref<4x128xf32, #tpu.memory_space<vmem>>) attributes {dimension_semantics = [#tpu.dimension_semantics<parallel>, #tpu.dimension_semantics<parallel>], iteration_bounds = array<i64: 1, 1>, scalar_prefetch = 0 : i64, scratch_operands = 0 : i64, tpu.core_type = #tpu.core_type<tc>, window_params = [{transform_indices = @transform_0, window_bounds = array<i64: 4, 128>}, {transform_indices = @transform_1, window_bounds = array<i64: 1, 128>}, {transform_indices = @transform_2, window_bounds = array<i64: 4, 128>}]} {
    %c0 = arith.constant 0 : index
    %c0_0 = arith.constant 0 : index
    %0 = vector.load %arg2[%c0, %c0_0] : memref<4x128xf32, #tpu.memory_space<vmem>>, vector<4x128xf32>
    %c0_1 = arith.constant 0 : index
    %c0_2 = arith.constant 0 : index
    %1 = vector.load %arg3[%c0_1, %c0_2] : memref<1x128xf32, #tpu.memory_space<vmem>>, vector<1x128xf32>
    %2 = vector.broadcast %1 : vector<1x128xf32> to vector<4x128xf32>
    %3 = arith.mulf %0, %2 : vector<4x128xf32>
    %c0_3 = arith.constant 0 : index
    %c0_4 = arith.constant 0 : index
    %4 = vector.load %arg4[%c0_3, %c0_4] : memref<4x128xf32, #tpu.memory_space<vmem>>, vector<4x128xf32>
    tpu.vector_store %arg4[%c0_3, %c0_4], %3 {strides = array<i32>} : memref<4x128xf32, #tpu.memory_space<vmem>>, vector<4x128xf32>,
    return
  }
  func.func @transform_0(%arg0: i32, %arg1: i32) -> (i32, i32) {
    %c0_i32 = arith.constant 0 : i32
    return %arg0, %arg1 : i32, i32
  }
  func.func @transform_1(%arg0: i32, %arg1: i32) -> (i32, i32) {
    %c0_i32 = arith.constant 0 : i32
    %c0_i32_0 = arith.constant 0 : i32
    return %c0_i32, %arg1 : i32, i32
  }
  func.func @transform_2(%arg0: i32, %arg1: i32) -> (i32, i32) {
    %c0_i32 = arith.constant 0 : i32
    return %arg0, %arg1 : i32, i32
  }
}

</mosaic_0001>

<bundles_post_ra>
// kernel: tpu_custom_call.1
= control target key start
LH: loop header
LB: loop body
LE: loop exit
PB: predicated region body
PF: predicated region fallthrough
CT: control target
= control target key end

     0   :  { %7 = vsyncpa [#allocation3], 0  ;;  %s122_s0 = inlined_call_operand.hbm [shape: f32[4,128], index: 0, kind: input, shape index: {}]   ;;  %s123_s1 = inlined_call_operand.vmem [shape: f32[1,128], index: 1, kind: input, shape index: {}]   ;;  %s124_s2 = inlined_call_operand.hbm [shape: f32[4,128], index: 2, kind: output, shape index: {}]  }
   0x1   :  { %8 = vsyncpa [#allocation4], 0  ;;  %s96_s9 = smov [#allocation2]  }
   0x2   :  { %s15_s10 = sshll.u32 %s96_s9, 4  ;;  %s16_s10 = int_to_ptr.vmem [resolvable:$true] %s15_s10 }
   0x3   :  { %s60_s11 = scalar_lea.vmem %s16_s10, 64  ;;  %p65_p1 = scmp.lt.s32.totalorder %s16_s10, %s16_s10 }
   0x4   :  { %p61_p0 = scmp.ne.s32.totalorder %s16_s10, %s60_s11  ;;  %p66_p2 = scmp.lt.s32.totalorder %s60_s11, %s60_s11 }
   0x6   :  { %p67_p3 = por %p66_p2, %p65_p1 }
   0x8   :  { %p68_p4 = pnand %p67_p3, %p61_p0 }
   0xa   :  { %71 = shalt.err (!%p68_p4)
}
   0xb   :  { %18 = dma.hbm_to_vmem [thread:$0]  %s122_s0, 64, %s16_s10, [#allocation3]  }
   0xc   :  { %92 = dma.done.wait [#allocation3], 64  }
   0xd   :  { %93 = vsyncadd [#allocation3], 4294967232  ;;  %s97_s14 = smov [#allocation5]   ;;  %v24_v0 = vld [vmem:[#allocation2] sm:$0xf] }
   0xe   :  { %s40_s15 = sshll.u32 %s97_s14, 4  ;;  %v49_v1 = vld [vmem:[%s123_s1] ss:$0 sm:$0xff]  ;;  %s41_s15 = int_to_ptr.vmem [resolvable:$true] %s40_s15 }
   0xf   :  { %v32_v2 = vmul.f32 %v49_v1, %v24_v0  ;;  %s72_s18 = scalar_lea.vmem %s41_s15, 64  ;;  %p77_p6 = scmp.lt.s32.totalorder %s41_s15, %s41_s15 }
  0x10   :  { %p73_p5 = scmp.ne.s32.totalorder %s41_s15, %s72_s18  ;;  %p78_p7 = scmp.lt.s32.totalorder %s72_s18, %s72_s18 }
  0x11   :  { %33 = vst [vmem:[#allocation5] sm:$0xf] %v32_v2 }
  0x12   :  { %p79_p8 = por %p78_p7, %p77_p6 }
  0x14   :  { %p80_p9 = pnand %p79_p8, %p73_p5 }
  0x16   :  { %83 = shalt.err (!%p80_p9)
}
  0x17   :  { %43 = dma.vmem_to_hbm [thread:$0]  %s41_s15, 64, %s124_s2, [#allocation4]  }
  0x18   :  { %94 = dma.done.wait [#allocation4], 64  }
  0x19   :  { %95 = vsyncadd [#allocation4], 4294967232 }
  0x1a   :  { %47 = vsyncpa [#allocation3], 1 }
  0x1b   :  { %48 = vsyncpa [#allocation4], 1 }

</bundles_post_ra>
